<compile_context>
chip_gen: v7x
topology: tpu7x:2x2x1
jax: 0.10.0
libtpu: 0.0.40
codegen_flags: <defaults>
</compile_context>

<pallas_src>
import jax
import jax.numpy as jnp
from jax.experimental import pallas as pl
from jax.experimental.pallas import tpu as pltpu


def _round_up(x, m):
    return ((x + m - 1) // m) * m


def _leaky_relu(x, neg_slope=0.2):
    return jnp.where(x > 0, x, neg_slope * x)


def _mlp_kernel(x_ref, w1_ref, b1_ref, w2_ref, b2_ref, w3_ref, b3_ref, o_ref):
    # Cast the streamed f32 feature tile to bf16 in-kernel (VPU has slack; the
    # MXU is the binding unit), so HBM only ever sees the f32 features once.
    x = x_ref[...].astype(jnp.bfloat16)

    # Layer 1: bf16 MXU matmul, f32 accumulation; bias + LeakyReLU in f32.
    h = jnp.dot(x, w1_ref[...], preferred_element_type=jnp.float32)
    h = _leaky_relu(h + b1_ref[...])
    # TODO(synk): Dropout is identity at inference; training-mode dropout would
    # use pltpu.prng_seed + pltpu.stateful_bernoulli.

    # Layer 2: bf16 MXU matmul, f32 accumulation.
    h = jnp.dot(h.astype(jnp.bfloat16), w2_ref[...],
                preferred_element_type=jnp.float32)
    h = _leaky_relu(h + b2_ref[...])

    # Output head Linear(h2, 1): contract H2 with the (1, H2P) weight row so the
    # batch tile lands in the LANE dim -> lane-dense (1, TB) output row.
    head = jax.lax.dot_general(
        w3_ref[...], h,
        dimension_numbers=(((1,), (1,)), ((), ())),
        preferred_element_type=jnp.float32)           # (1, TB)
    o_ref[...] = (head + b3_ref[...]).reshape(o_ref.shape)


def prepare_params(params):
    """One-time pad + cast of weights (hoisted out of the per-call hot path).

    params: w_i of shape (in, out), b_i of shape (1, out) (PyTorch Linear,
    stored pre-transposed). Hidden dims are zero-padded to multiples of 128.
    """
    w1, b1 = params["w1"], params["b1"]
    w2, b2 = params["w2"], params["b2"]
    w3, b3 = params["w3"], params["b3"]
    D, H1 = w1.shape
    H2 = w2.shape[1]
    H1P, H2P = _round_up(H1, 128), _round_up(H2, 128)

    def pad2(a, rows, cols):
        r, c = a.shape
        if (r, c) == (rows, cols):
            return a
        return jnp.pad(a, ((0, rows - r), (0, cols - c)))

    return {
        "w1": pad2(w1, D, H1P).astype(jnp.bfloat16),
        "b1": pad2(b1.reshape(1, H1), 1, H1P).astype(jnp.float32),
        "w2": pad2(w2, H1P, H2P).astype(jnp.bfloat16),
        "b2": pad2(b2.reshape(1, H2), 1, H2P).astype(jnp.float32),
        "w3": pad2(w3.reshape(1, H2), 1, H2P).astype(jnp.float32),  # (1, H2P)
        "b3": b3.reshape(1, 1).astype(jnp.float32),
    }


def _vmem_bytes(TB, D, H1P, H2P):
    """Conservative VMEM requirement (assumes double-buffering everywhere)."""
    x_tiles = 2 * TB * D * 4                               # streamed f32 features
    weights = 2 * (D * H1P + H1P * H2P) * 2                # resident bf16 weights
    biases = 2 * (H1P + 2 * H2P + 1) * 4                   # f32 biases + w3 row
    interm = TB * (H1P + H2P) * 4                          # f32 activations
    out_tiles = 2 * TB * 4                                 # f32 output rows
    return x_tiles + weights + biases + interm + out_tiles


def style_discriminator_forward(features, prepared, *, tile_batch=1024,
                                vmem_budget_bytes=40 << 20):
    """features: (B, input_dim) float32. prepared: output of prepare_params()."""
    if features.ndim == 1:
        features = features[None, :]
    if features.dtype != jnp.float32:
        features = features.astype(jnp.float32)

    w1p, b1p = prepared["w1"], prepared["b1"]
    w2p, b2p = prepared["w2"], prepared["b2"]
    w3p, b3p = prepared["w3"], prepared["b3"]
    D, H1P = w1p.shape
    H2P = w2p.shape[1]
    if features.shape[1] != D:
        raise ValueError("Input feature dimension mismatch for StyleDiscriminator.")
    B = features.shape[0]

    # Batch tile: multiple of 128 (clean MXU cadence / fully packed bf16 vregs),
    # capped near B/2 so the grid keeps >= 2 steps for moderate B (v7x megacore),
    # then stepped down against the VMEM budget.
    TB = _round_up(max(tile_batch, 128), 128)
    TB = min(TB, max(128, _round_up(pl.cdiv(B, 2), 128)))
    while TB > 128 and _vmem_bytes(TB, D, H1P, H2P) > vmem_budget_bytes:
        TB -= 128
    num_tiles = pl.cdiv(B, TB)

    # Explicit scoped-VMEM limit sized from the real requirement (covers v5e's
    # 16 MiB default and stays under v7x's 64 MiB physical VMEM for sane TB).
    req = _vmem_bytes(TB, D, H1P, H2P)
    vmem_limit = min(max(int(req * 1.25) + (2 << 20), 16 << 20), 100 << 20)

    # Resident parameter blocks: constant index_map => no re-DMA across grid
    # steps. (pipeline_mode=pl.Buffered(1) would also halve their VMEM footprint
    # on v7x; left to the default pipeliner here and accounted for in `req`.)
    const = lambda shape: pl.BlockSpec(shape, lambda i: (0,) * len(shape))

    out = pl.pallas_call(
        _mlp_kernel,
        out_shape=jax.ShapeDtypeStruct((num_tiles, 1, TB), jnp.float32),
        grid=(num_tiles,),
        in_specs=[
            pl.BlockSpec((TB, D), lambda i: (i, 0)),   # streamed f32 feature tiles
            const((D, H1P)), const((1, H1P)),          # resident weights / biases
            const((H1P, H2P)), const((1, H2P)),
            const((1, H2P)), const((1, 1)),
        ],
        out_specs=pl.BlockSpec((1, 1, TB), lambda i: (i, 0, 0)),  # lane-dense rows
        compiler_params=pltpu.CompilerParams(
            dimension_semantics=("parallel",),
            vmem_limit_bytes=vmem_limit),
    )(features, w1p, b1p, w2p, b2p, w3p, b3p)

    # (num_tiles, 1, TB) -> (num_tiles*TB, 1); drop padded tail rows (tiny copy).
    return out.reshape(-1, 1)[:B]


def init_params(key, input_dim, hidden_dims):
    """Deterministic init mirroring nn.Linear shapes (stored pre-transposed as (in, out))."""
    dims = [input_dim] + list(hidden_dims) + [1]
    params = {}
    for i, (d_in, d_out) in enumerate(zip(dims[:-1], dims[1:]), start=1):
        key, kw, kb = jax.random.split(key, 3)
        bound = 1.0 / jnp.sqrt(jnp.float32(d_in))
        params[f"w{i}"] = jax.random.uniform(
            kw, (d_in, d_out), jnp.float32, minval=-bound, maxval=bound)
        params[f"b{i}"] = jax.random.uniform(
            kb, (1, d_out), jnp.float32, minval=-bound, maxval=bound)
    return params


def _reference_forward_f32(features, params):
    h = _leaky_relu(features @ params["w1"] + params["b1"])
    h = _leaky_relu(h @ params["w2"] + params["b2"])
    return h @ params["w3"] + params["b3"]


def _reference_forward_bf16(features, params):
    """Mirrors kernel numerics: bf16 matmul operands, f32 accumulation."""
    x = features.astype(jnp.bfloat16)
    h = jnp.dot(x, params["w1"].astype(jnp.bfloat16),
                preferred_element_type=jnp.float32) + params["b1"]
    h = _leaky_relu(h)
    h = jnp.dot(h.astype(jnp.bfloat16), params["w2"].astype(jnp.bfloat16),
                preferred_element_type=jnp.float32) + params["b2"]
    h = _leaky_relu(h)
    return h @ params["w3"] + params["b3"]


if __name__ == "__main__":
    # Small shapes consistent with the module's forward: (batch, input_dim).
    batch, input_dim = 2, 32
    hidden_dims = [64, 32]

    key = jax.random.PRNGKey(0)
    key, kx = jax.random.split(key)
    features = jax.random.normal(kx, (batch, input_dim), jnp.float32)
    params = init_params(key, input_dim, hidden_dims)
    prepared = prepare_params(params)   # one-time pad/cast, reused across calls

    logits = jax.block_until_ready(style_discriminator_forward(features, prepared))
    assert logits.shape == (batch, 1), logits.shape
    assert jnp.allclose(logits, _reference_forward_bf16(features, params),
                        atol=5e-3, rtol=5e-3), "mismatch vs bf16-matched reference"
    assert jnp.allclose(logits, _reference_forward_f32(features, params),
                        atol=5e-2, rtol=5e-2), "mismatch vs f32 reference"

    # Multi-tile + ragged batch: exercises the >=2-step pipelined grid and the
    # Pallas-handled partial last input block (no wrapper padding).
    feats2 = jax.random.normal(jax.random.PRNGKey(1), (300, input_dim), jnp.float32)
    logits2 = jax.block_until_ready(
        style_discriminator_forward(feats2, prepared, tile_batch=256))
    assert logits2.shape == (300, 1), logits2.shape
    assert jnp.allclose(logits2, _reference_forward_bf16(feats2, params),
                        atol=5e-3, rtol=5e-3), "mismatch on multi-tile batch"

    print("KERNEL_OK")
</pallas_src>

<mosaic_0001>
module attributes {stable_mosaic.version = 11 : i64} {
  func.func @_mlp_kernel(%arg0: i32, %arg1: memref<128x32xf32, #tpu.memory_space<vmem>>, %arg2: memref<32x128xbf16, #tpu.memory_space<vmem>>, %arg3: memref<1x128xf32, #tpu.memory_space<vmem>>, %arg4: memref<128x128xbf16, #tpu.memory_space<vmem>>, %arg5: memref<1x128xf32, #tpu.memory_space<vmem>>, %arg6: memref<1x128xf32, #tpu.memory_space<vmem>>, %arg7: memref<1x1xf32, #tpu.memory_space<vmem>>, %arg8: memref<1x1x128xf32, #tpu.memory_space<vmem>>) attributes {dimension_semantics = [#tpu.dimension_semantics<parallel>], iteration_bounds = array<i64: 1>, scalar_prefetch = 0 : i64, scratch_operands = 0 : i64, tpu.core_type = #tpu.core_type<tc>, window_params = [{transform_indices = @transform_0, window_bounds = array<i64: 128, 32>}, {pipeline_mode = #tpu.pipeline_mode<synchronous>, transform_indices = @transform_1, window_bounds = array<i64: 32, 128>}, {pipeline_mode = #tpu.pipeline_mode<synchronous>, transform_indices = @transform_2, window_bounds = array<i64: 1, 128>}, {pipeline_mode = #tpu.pipeline_mode<synchronous>, transform_indices = @transform_3, window_bounds = array<i64: 128, 128>}, {pipeline_mode = #tpu.pipeline_mode<synchronous>, transform_indices = @transform_4, window_bounds = array<i64: 1, 128>}, {pipeline_mode = #tpu.pipeline_mode<synchronous>, transform_indices = @transform_5, window_bounds = array<i64: 1, 128>}, {pipeline_mode = #tpu.pipeline_mode<synchronous>, transform_indices = @transform_6, window_bounds = array<i64: 1, 1>}, {transform_indices = @transform_7, window_bounds = array<i64: 1, 1, 128>}]} {
    %c0 = arith.constant 0 : index
    %c0_0 = arith.constant 0 : index
    %0 = vector.load %arg1[%c0, %c0_0] : memref<128x32xf32, #tpu.memory_space<vmem>>, vector<128x32xf32>
    %1 = arith.truncf %0 : vector<128x32xf32> to vector<128x32xbf16>
    %c0_1 = arith.constant 0 : index
    %c0_2 = arith.constant 0 : index
    %2 = vector.load %arg2[%c0_1, %c0_2] : memref<32x128xbf16, #tpu.memory_space<vmem>>, vector<32x128xbf16>
    %cst = arith.constant dense<0.000000e+00> : vector<128x128xf32>
    %3 = tpu.matmul %1, %2, %cst {dimension_numbers = #tpu.dot_dimension_numbers<[1], [0], [0], [1], [0, 0, 1, 1], [], []>} : vector<128x32xbf16>, vector<32x128xbf16>, vector<128x128xf32> -> vector<128x128xf32>
    %c0_3 = arith.constant 0 : index
    %c0_4 = arith.constant 0 : index
    %4 = vector.load %arg3[%c0_3, %c0_4] : memref<1x128xf32, #tpu.memory_space<vmem>>, vector<1x128xf32>
    %5 = vector.broadcast %4 : vector<1x128xf32> to vector<128x128xf32>
    %6 = arith.addf %3, %5 : vector<128x128xf32>
    %cst_5 = arith.constant 0.000000e+00 : f32
    %7 = vector.broadcast %cst_5 : f32 to vector<128x128xf32>
    %8 = arith.cmpf ogt, %6, %7 : vector<128x128xf32>
    %cst_6 = arith.constant 2.000000e-01 : f32
    %9 = vector.broadcast %cst_6 : f32 to vector<128x128xf32>
    %10 = arith.mulf %9, %6 : vector<128x128xf32>
    %11 = arith.select %8, %6, %10 : vector<128x128xi1>, vector<128x128xf32>
    %12 = arith.truncf %11 : vector<128x128xf32> to vector<128x128xbf16>
    %c0_7 = arith.constant 0 : index
    %c0_8 = arith.constant 0 : index
    %13 = vector.load %arg4[%c0_7, %c0_8] : memref<128x128xbf16, #tpu.memory_space<vmem>>, vector<128x128xbf16>
    %cst_9 = arith.constant dense<0.000000e+00> : vector<128x128xf32>
    %14 = tpu.matmul %12, %13, %cst_9 {dimension_numbers = #tpu.dot_dimension_numbers<[1], [0], [0], [1], [0, 0, 1, 1], [], []>} : vector<128x128xbf16>, vector<128x128xbf16>, vector<128x128xf32> -> vector<128x128xf32>
    %c0_10 = arith.constant 0 : index
    %c0_11 = arith.constant 0 : index
    %15 = vector.load %arg5[%c0_10, %c0_11] : memref<1x128xf32, #tpu.memory_space<vmem>>, vector<1x128xf32>
    %16 = vector.broadcast %15 : vector<1x128xf32> to vector<128x128xf32>
    %17 = arith.addf %14, %16 : vector<128x128xf32>
    %cst_12 = arith.constant 0.000000e+00 : f32
    %18 = vector.broadcast %cst_12 : f32 to vector<128x128xf32>
    %19 = arith.cmpf ogt, %17, %18 : vector<128x128xf32>
    %cst_13 = arith.constant 2.000000e-01 : f32
    %20 = vector.broadcast %cst_13 : f32 to vector<128x128xf32>
    %21 = arith.mulf %20, %17 : vector<128x128xf32>
    %22 = arith.select %19, %17, %21 : vector<128x128xi1>, vector<128x128xf32>
    %c0_14 = arith.constant 0 : index
    %c0_15 = arith.constant 0 : index
    %23 = vector.load %arg6[%c0_14, %c0_15] : memref<1x128xf32, #tpu.memory_space<vmem>>, vector<1x128xf32>
    %cst_16 = arith.constant dense<0.000000e+00> : vector<1x128xf32>
    %24 = tpu.matmul %23, %22, %cst_16 {dimension_numbers = #tpu.dot_dimension_numbers<[1], [1], [0], [0], [0, 0, 1, 0], [], []>} : vector<1x128xf32>, vector<128x128xf32>, vector<1x128xf32> -> vector<1x128xf32>
    %c0_17 = arith.constant 0 : index
    %c0_18 = arith.constant 0 : index
    %25 = vector.load %arg7[%c0_17, %c0_18] : memref<1x1xf32, #tpu.memory_space<vmem>>, vector<1x1xf32>
    %26 = vector.broadcast %25 : vector<1x1xf32> to vector<1x128xf32>
    %27 = arith.addf %24, %26 : vector<1x128xf32>
    %28 = vector.shape_cast %27 : vector<1x128xf32> to vector<1x1x128xf32>
    %c0_19 = arith.constant 0 : index
    %c0_20 = arith.constant 0 : index
    %c0_21 = arith.constant 0 : index
    %29 = vector.load %arg8[%c0_19, %c0_20, %c0_21] : memref<1x1x128xf32, #tpu.memory_space<vmem>>, vector<1x1x128xf32>
    tpu.vector_store %arg8[%c0_19, %c0_20, %c0_21], %28 {strides = array<i32>} : memref<1x1x128xf32, #tpu.memory_space<vmem>>, vector<1x1x128xf32>,
    return
  }
  func.func @transform_0(%arg0: i32) -> (i32, i32) {
    %c0_i32 = arith.constant 0 : i32
    %c0_i32_0 = arith.constant 0 : i32
    return %arg0, %c0_i32 : i32, i32
  }
  func.func @transform_1(%arg0: i32) -> (i32, i32) {
    %c0_i32 = arith.constant 0 : i32
    %c0_i32_0 = arith.constant 0 : i32
    %c0_i32_1 = arith.constant 0 : i32
    return %c0_i32, %c0_i32_0 : i32, i32
  }
  func.func @transform_2(%arg0: i32) -> (i32, i32) {
    %c0_i32 = arith.constant 0 : i32
    %c0_i32_0 = arith.constant 0 : i32
    %c0_i32_1 = arith.constant 0 : i32
    return %c0_i32, %c0_i32_0 : i32, i32
  }
  func.func @transform_3(%arg0: i32) -> (i32, i32) {
    %c0_i32 = arith.constant 0 : i32
    %c0_i32_0 = arith.constant 0 : i32
    %c0_i32_1 = arith.constant 0 : i32
    return %c0_i32, %c0_i32_0 : i32, i32
  }
  func.func @transform_4(%arg0: i32) -> (i32, i32) {
    %c0_i32 = arith.constant 0 : i32
    %c0_i32_0 = arith.constant 0 : i32
    %c0_i32_1 = arith.constant 0 : i32
    return %c0_i32, %c0_i32_0 : i32, i32
  }
  func.func @transform_5(%arg0: i32) -> (i32, i32) {
    %c0_i32 = arith.constant 0 : i32
    %c0_i32_0 = arith.constant 0 : i32
    %c0_i32_1 = arith.constant 0 : i32
    return %c0_i32, %c0_i32_0 : i32, i32
  }
  func.func @transform_6(%arg0: i32) -> (i32, i32) {
    %c0_i32 = arith.constant 0 : i32
    %c0_i32_0 = arith.constant 0 : i32
    %c0_i32_1 = arith.constant 0 : i32
    return %c0_i32, %c0_i32_0 : i32, i32
  }
  func.func @transform_7(%arg0: i32) -> (i32, i32, i32) {
    %c0_i32 = arith.constant 0 : i32
    %c0_i32_0 = arith.constant 0 : i32
    %c0_i32_1 = arith.constant 0 : i32
    return %arg0, %c0_i32, %c0_i32_0 : i32, i32, i32
  }
}

</mosaic_0001>

<bundles_post_ra>
// kernel: tpu_custom_call.1
= control target key start
LH: loop header
LB: loop body
LE: loop exit
PB: predicated region body
PF: predicated region fallthrough
CT: control target
= control target key end

     0   :  { %s1060_s0 = inlined_call_operand.vmem [shape: f32[2,32], index: 0, kind: input, shape index: {}]   ;;  %s1061_s1 = inlined_call_operand.hbm [shape: bf16[32,128], index: 1, kind: input, shape index: {}]   ;;  %s1062_s2 = inlined_call_operand.vmem [shape: f32[1,128], index: 2, kind: input, shape index: {}]   ;;  %s1063_s3 = inlined_call_operand.hbm [shape: bf16[128,128], index: 3, kind: input, shape index: {}]   ;;  %s1064_s4 = inlined_call_operand.vmem [shape: f32[1,128], index: 4, kind: input, shape index: {}]   ;;  %s1065_s5 = inlined_call_operand.vmem [shape: f32[1,128], index: 5, kind: input, shape index: {}]   ;;  %s1066_s6 = inlined_call_operand.<no memory space> [shape: f32[1,1], index: 6, kind: input, shape index: {}]   ;;  %s1067_s7 = inlined_call_operand.hbm [shape: f32[1,1,128], index: 7, kind: output, shape index: {}]  }
   0x1   :  { %v12_v0 = vstv %s1066_s6 }
   0x2   :  { %13 = vst [vmem:[#allocation2] sm:$0x1] %v12_v0 }
   0x3   :  { %14 = vsyncpa [#allocation4], 0 }
   0x4   :  { %15 = vsyncpa [#allocation7], 0 }
   0x5   :  { %16 = vsyncpa [#allocation5], 0  ;;  %s863_s26 = smov [#allocation3]   ;;  %s791_s30 = scalar_lea.hbm %s1061_s1, 256 }
   0x6   :  { %s24_s27 = sshll.u32 %s863_s26, 4  ;;  %p792_p0 = scmp.ne.s32.totalorder %s1061_s1, %s791_s30  ;;  %s25_s27 = int_to_ptr.vmem [resolvable:$true] %s24_s27 }
   0x7   :  { %p795_p1 = scmp.lt.u32.totalorder %s791_s30, %s1061_s1 }
   0x9   :  { %p797_p2 = pnand %p795_p1, %p792_p0 }
   0xb   :  { %800 = shalt.err (!%p797_p2)
}
   0xc   :  { %s801_s6 = scalar_lea.vmem %s25_s27, 256  ;;  %p806_p4 = scmp.lt.s32.totalorder %s25_s27, %s25_s27 }
   0xd   :  { %p802_p3 = scmp.ne.s32.totalorder %s25_s27, %s801_s6  ;;  %p807_p5 = scmp.lt.s32.totalorder %s801_s6, %s801_s6 }
   0xf   :  { %p808_p6 = por %p807_p5, %p806_p4 }
  0x11   :  { %p809_p7 = pnand %p808_p6, %p802_p3 }
  0x13   :  { %812 = shalt.err (!%p809_p7)
}
  0x14   :  { %s864_s12 = smov 64   ;;  %s865_s13 = smov 4  }
  0x15   :  { %30 = dma.hbm_to_vmem [thread:$0]  %s1061_s1, 256, %s25_s27, [#allocation4], %s864_s12, %s864_s12, %s865_s13  }
  0x16   :  { %s866_s16 = smov [#allocation6]   ;;  %s813_s20 = scalar_lea.hbm %s1063_s3, 1024 }
  0x17   :  { %s38_s17 = sshll.u32 %s866_s16, 4  ;;  %p814_p8 = scmp.ne.s32.totalorder %s1063_s3, %s813_s20  ;;  %s39_s17 = int_to_ptr.vmem [resolvable:$true] %s38_s17 }
  0x18   :  { %p817_p9 = scmp.lt.u32.totalorder %s813_s20, %s1063_s3 }
  0x1a   :  { %p819_p10 = pnand %p817_p9, %p814_p8 }
  0x1c   :  { %822 = shalt.err (!%p819_p10)
}
  0x1d   :  { %s823_s25 = scalar_lea.vmem %s39_s17, 1024  ;;  %p828_p12 = scmp.lt.s32.totalorder %s39_s17, %s39_s17 }
  0x1e   :  { %p824_p11 = scmp.ne.s32.totalorder %s39_s17, %s823_s25  ;;  %p829_p13 = scmp.lt.s32.totalorder %s823_s25, %s823_s25 }
  0x20   :  { %p830_p0 = por %p829_p13, %p828_p12 }
  0x22   :  { %p831_p1 = pnand %p830_p0, %p824_p11 }
  0x24   :  { %834 = shalt.err (!%p831_p1)
}
  0x25   :  { %44 = dma.hbm_to_vmem [thread:$0]  %s1063_s3, 1024, %s39_s17, [#allocation7], %s864_s12, %s864_s12, %s865_s13  }
  0x26   :  { %857 = dma.done.wait [#allocation4], 256  }
  0x27   :  { %858 = vsyncadd [#allocation4], 4294967040 }
  0x28   :  { %859 = dma.done.wait [#allocation7], 1024  }
  0x29   :  { %860 = vsyncadd [#allocation7], 4294966272  ;;  %v781_v1 = vld [vmem:[#allocation3] sm:$0xff]   ;;  %v782_v2 = vld [vmem:[#allocation3 + $0x8] sm:$0xff]   ;;  %vm105_vm0 = vcmask 261120   ;;  %s871_s6 = smov [#allocation8]  }
  0x2a   :  { %660 = vmatprep.subr.bf16.mxu1 %v781_v1  ;;  %v58_v3 = vld [vmem:[%s1060_s0] sm:$0xff]  ;;  %v59_v4 = vld [vmem:[%s1060_s0 + $0x8] sm:$0xff]  ;;  %v60_v6 = vld [vmem:[%s1060_s0 + $0x10] sm:$0xff]  ;;  %s587_s12 = sshll.u32 %s871_s6, 4  ;;  %s588_s12 = int_to_ptr.vmem [resolvable:$true] %s587_s12 }
  0x2b   :  { %661 = vmatpush3.bf16.msra.mxu1 %v781_v1  ;;  %v74_v5 = vpack.c.bf16 %v59_v4, %v58_v3  ;;  %v61_v7 = vld [vmem:[%s1060_s0 + $0x18] sm:$0xff]  ;;  %v62_v8 = vld [vmem:[%s1060_s0 + $0x20] sm:$0xff]  ;;  %v63_v9 = vld [vmem:[%s1060_s0 + $0x28] sm:$0xff]  ;;  %s835_s13 = scalar_lea.vmem %s588_s12, 16  ;;  %s839_s14 = scalar_lea.vmem %s588_s12, 32 }
  0x2c   :  { %662 = vmatprep.subr.bf16.mxu1 %v782_v2  ;;  %v75_v10 = vpack.c.bf16 %v61_v7, %v60_v6  ;;  %v76_v11 = vpack.c.bf16 %v63_v9, %v62_v8  ;;  %v783_v12 = vld [vmem:[#allocation6] sm:$0xff]   ;;  %v784_v15 = vld [vmem:[#allocation6 + $0x8] sm:$0xff]   ;;  %v67_v17 = vld [vmem:[%s1060_s0 + $0x48] sm:$0xff]  ;;  %p836_p2 = scmp.ne.s32.totalorder %s588_s12, %s835_s13  ;;  %p840_p3 = scmp.lt.s32.totalorder %s588_s12, %s588_s12 }
  0x2d   :  { %664 = vmatprep.mubr.msk.bf16.mxu1 %vm105_vm0, %v74_v5  ;;  %v64_v13 = vld [vmem:[%s1060_s0 + $0x30] sm:$0xff]  ;;  %v65_v14 = vld [vmem:[%s1060_s0 + $0x38] sm:$0xff]  ;;  %v66_v16 = vld [vmem:[%s1060_s0 + $0x40] sm:$0xff]  ;;  %p841_p4 = scmp.lt.s32.totalorder %s839_s14, %s835_s13 }
  0x2e   :  { %v785_v18 = vld [vmem:[#allocation6 + $0x10] sm:$0xff]   ;;  %v77_v19 = vpack.c.bf16 %v65_v14, %v64_v13  ;;  %v78_v20 = vpack.c.bf16 %v67_v17, %v66_v16  ;;  %v786_v21 = vld [vmem:[#allocation6 + $0x18] sm:$0xff]   ;;  %v69_v23 = vld [vmem:[%s1060_s0 + $0x58] sm:$0xff] }
  0x2f   :  { %663 = vmatpush3.bf16.msra.mxu1 %v782_v2  ;;  %v68_v22 = vld [vmem:[%s1060_s0 + $0x50] sm:$0xff]  ;;  %v70_v24 = vld [vmem:[%s1060_s0 + $0x60] sm:$0xff]  ;;  %v71_v25 = vld [vmem:[%s1060_s0 + $0x68] sm:$0xff]  ;;  %p842_p5 = por %p841_p4, %p840_p3 }
  0x30   :  { %680 = vmatprep.subr.bf16.mxu1 %v783_v12  ;;  %v787_v26 = vld [vmem:[#allocation6 + $0x20] sm:$0xff]   ;;  %v79_v27 = vpack.c.bf16 %v69_v23, %v68_v22  ;;  %v80_v28 = vpack.c.bf16 %v71_v25, %v70_v24  ;;  %v788_v29 = vld [vmem:[#allocation6 + $0x28] sm:$0xff]   ;;  %v789_v33 = vld [vmem:[#allocation6 + $0x30] sm:$0xff]  }
  0x31   :  { %v72_v30 = vld [vmem:[%s1060_s0 + $0x70] sm:$0xff]  ;;  %v73_v31 = vld [vmem:[%s1060_s0 + $0x78] sm:$0xff]  ;;  %v998_v35 = vld [vmem:[%s1062_s2] ss:$0 sm:$0xff]  ;;  %p843_p6 = pnand %p842_p5, %p836_p2 }
  0x32   :  { %665 = vmatmul.mubr.msk.bf16.vlgmr.msra.gmra.mrb[0].mxu1 %vm105_vm0, %v75_v10  ;;  %v81_v32 = vpack.c.bf16 %v73_v31, %v72_v30  ;;  %v790_v34 = vld [vmem:[#allocation6 + $0x38] sm:$0xff]  }
  0x33   :  { %668 = vmatprep.mubr.msk.bf16.mxu1 %vm105_vm0, %v76_v11  ;;  %681 = vmatpush3.bf16.msra.mxu1 %v783_v12 }
  0x34   :  { %682 = vmatprep.subr.bf16.mxu1 %v784_v15 }
  0x37   :  { %683 = vmatpush3.bf16.msra.mxu1 %v784_v15 }
  0x38   :  { %684 = vmatprep.subr.bf16.mxu1 %v785_v18 }
  0x3a   :  { %669 = vmatmul.mubr.msk.bf16.gmra.mrb[4].mxu1 %vm105_vm0, %v77_v19 }
  0x3b   :  { %672 = vmatprep.mubr.msk.bf16.mxu1 %vm105_vm0, %v78_v20  ;;  %685 = vmatpush3.bf16.msra.mxu1 %v785_v18 }
  0x3c   :  { %686 = vmatprep.subr.bf16.mxu1 %v786_v21 }
  0x3f   :  { %687 = vmatpush3.bf16.msra.mxu1 %v786_v21 }
  0x40   :  { %688 = vmatprep.subr.bf16.mxu1 %v787_v26 }
  0x42   :  { %673 = vmatmul.mubr.msk.bf16.gmra.mrb[8].mxu1 %vm105_vm0, %v79_v27 }
  0x43   :  { %676 = vmatprep.mubr.msk.bf16.mxu1 %vm105_vm0, %v80_v28  ;;  %689 = vmatpush3.bf16.msra.mxu1 %v787_v26 }
  0x44   :  { %690 = vmatprep.subr.bf16.mxu1 %v788_v29 }
  0x47   :  { %691 = vmatpush3.bf16.msra.mxu1 %v788_v29 }
  0x48   :  { %692 = vmatprep.subr.bf16.mxu1 %v789_v33 }
  0x4a   :  { %677 = vmatmul.mubr.msk.bf16.gmra.mrb[12].mxu1 %vm105_vm0, %v81_v32 }
  0x4b   :  { %693 = vmatpush3.bf16.msra.mxu1 %v789_v33 }
  0x4c   :  { %694 = vmatprep.subr.bf16.mxu1 %v790_v34 }
  0x4f   :  { %695 = vmatpush3.bf16.msra.mxu1 %v790_v34 }
 0x105   :  { %v666_v36 = vpop.f32.mrb[0].mxu1 }
 0x106   :  { %v173_v37 = vadd.f32 %v666_v36, %v998_v35  ;;  %v164_v38 = vpop.f32.mrb[1].mxu1 }
 0x107   :  { %v165_v39 = vadd.f32 %v998_v35, %v164_v38  ;;  %v667_v40 = vpop.f32.mrb[2].mxu1 }
 0x108   :  { %v245_v41 = vmul.f32 0.2, %v173_v37  ;;  %v176_v42 = vadd.f32 %v667_v40, %v998_v35  ;;  %v167_v43 = vpop.f32.mrb[3].mxu1  ;;  %vm229_vm1 = vcmp.gt.f32.partialorder %v173_v37, 0.0 }
 0x109   :  { %v243_v44 = vmul.f32 0.2, %v165_v39  ;;  %v168_v45 = vadd.f32 %v998_v35, %v167_v43  ;;  %vm227_vm2 = vcmp.gt.f32.partialorder %v165_v39, 0.0 }
 0x10a   :  { %vm230_vm3 = vcmp.gt.f32.partialorder %v176_v42, 0.0  ;;  %v246_v46 = vmul.f32 0.2, %v176_v42  ;;  %v261_v48 = vsel %vm229_vm1, %v173_v37, %v245_v41  ;;  %vm868_vm1 = vmmov 0  }
 0x10b   :  { %vm228_vm4 = vcmp.gt.f32.partialorder %v168_v45, 0.0  ;;  %v244_v47 = vmul.f32 0.2, %v168_v45  ;;  %v259_v52 = vsel %vm227_vm2, %v165_v39, %v243_v44 }
 0x10c   :  { %v262_v49 = vsel %vm230_vm3, %v176_v42, %v246_v46  ;;  %v869_v46 = vmov 0.0  }
 0x10d   :  { %v276_v50 = vpack.c.bf16 %v262_v49, %v261_v48  ;;  %v670_v51 = vpop.f32.mrb[4].mxu1  ;;  %v260_v53 = vsel %vm228_vm4, %v168_v45, %v244_v47  ;;  %v867_v45 = vmov 0.0|0.0   ;;  %744 = vmatprep.mubr.msk.f32.mxu0 %vm868_vm1, %v869_v46  ;;  %v500_v47 = vld [vmem:[#allocation2] sm:$0x1] }
 0x10e   :  { %v189_v54 = vadd.f32 %v670_v51, %v998_v35  ;;  %v180_v55 = vpop.f32.mrb[5].mxu1  ;;  %v275_v56 = vpack.c.bf16 %v260_v53, %v259_v52  ;;  %747 = vmatprep.subr.bf16.mxu0 %v867_v45  ;;  %v1020_v48 = vld [vmem:[%s1064_s4] ss:$0 sm:$0xff] }
 0x10f   :  { %v181_v57 = vadd.f32 %v998_v35, %v180_v55  ;;  %v671_v58 = vpop.f32.mrb[6].mxu1 }
 0x110   :  { %vm233_vm5 = vcmp.gt.f32.partialorder %v189_v54, 0.0  ;;  %v249_v59 = vmul.f32 0.2, %v189_v54  ;;  %v192_v60 = vadd.f32 %v671_v58, %v998_v35  ;;  %v183_v61 = vpop.f32.mrb[7].mxu1  ;;  %696 = vmatprep.mubr.bf16.mxu1 %v275_v56 }
 0x111   :  { %vm231_vm6 = vcmp.gt.f32.partialorder %v181_v57, 0.0  ;;  %v247_v62 = vmul.f32 0.2, %v181_v57  ;;  %v184_v63 = vadd.f32 %v998_v35, %v183_v61  ;;  %697 = vmatmul.mubr.bf16.vlgmr.msra.gmra.mrb[16].mxu1 %v276_v50 }
 0x112   :  { %vm234_vm7 = vcmp.gt.f32.partialorder %v192_v60, 0.0  ;;  %v250_v0 = vmul.f32 0.2, %v192_v60  ;;  %v265_v1 = vsel %vm233_vm5, %v189_v54, %v249_v59 }
 0x113   :  { %vm232_vm8 = vcmp.gt.f32.partialorder %v184_v63, 0.0  ;;  %v248_v2 = vmul.f32 0.2, %v184_v63  ;;  %v263_v3 = vsel %vm231_vm6, %v181_v57, %v247_v62 }
 0x114   :  { %v266_v4 = vsel %vm234_vm7, %v192_v60, %v250_v0 }
 0x115   :  { %v264_v5 = vsel %vm232_vm8, %v184_v63, %v248_v2  ;;  %v278_v6 = vpack.c.bf16 %v266_v4, %v265_v1  ;;  %v674_v7 = vpop.f32.mrb[8].mxu1 }
 0x116   :  { %v277_v8 = vpack.c.bf16 %v264_v5, %v263_v3  ;;  %v205_v9 = vadd.f32 %v674_v7, %v998_v35  ;;  %v196_v10 = vpop.f32.mrb[9].mxu1 }
 0x117   :  { %v197_v11 = vadd.f32 %v998_v35, %v196_v10  ;;  %v675_v12 = vpop.f32.mrb[10].mxu1 }
 0x118   :  { %700 = vmatprep.mubr.bf16.mxu1 %v277_v8  ;;  %vm237_vm9 = vcmp.gt.f32.partialorder %v205_v9, 0.0  ;;  %v253_v13 = vmul.f32 0.2, %v205_v9  ;;  %v208_v14 = vadd.f32 %v675_v12, %v998_v35  ;;  %v199_v15 = vpop.f32.mrb[11].mxu1 }
 0x119   :  { %701 = vmatmul.mubr.bf16.gmra.mrb[20].mxu1 %v278_v6  ;;  %vm235_vm10 = vcmp.gt.f32.partialorder %v197_v11, 0.0  ;;  %v251_v16 = vmul.f32 0.2, %v197_v11  ;;  %v200_v17 = vadd.f32 %v998_v35, %v199_v15 }
 0x11a   :  { %vm238_vm11 = vcmp.gt.f32.partialorder %v208_v14, 0.0  ;;  %v254_v18 = vmul.f32 0.2, %v208_v14  ;;  %v269_v19 = vsel %vm237_vm9, %v205_v9, %v253_v13 }
 0x11b   :  { %vm236_vm12 = vcmp.gt.f32.partialorder %v200_v17, 0.0  ;;  %v252_v20 = vmul.f32 0.2, %v200_v17  ;;  %v267_v21 = vsel %vm235_vm10, %v197_v11, %v251_v16 }
 0x11c   :  { %v270_v22 = vsel %vm238_vm11, %v208_v14, %v254_v18 }
 0x11d   :  { %v268_v23 = vsel %vm236_vm12, %v200_v17, %v252_v20  ;;  %v280_v24 = vpack.c.bf16 %v270_v22, %v269_v19  ;;  %v678_v25 = vpop.f32.mrb[12].mxu1 }
 0x11e   :  { %v279_v26 = vpack.c.bf16 %v268_v23, %v267_v21  ;;  %v221_v27 = vadd.f32 %v678_v25, %v998_v35  ;;  %v212_v28 = vpop.f32.mrb[13].mxu1 }
 0x11f   :  { %v213_v29 = vadd.f32 %v998_v35, %v212_v28  ;;  %v679_v30 = vpop.f32.mrb[14].mxu1 }
 0x120   :  { %704 = vmatprep.mubr.bf16.mxu1 %v279_v26  ;;  %vm241_vm13 = vcmp.gt.f32.partialorder %v221_v27, 0.0  ;;  %v257_v31 = vmul.f32 0.2, %v221_v27  ;;  %v224_v32 = vadd.f32 %v679_v30, %v998_v35  ;;  %v215_v33 = vpop.f32.mrb[15].mxu1 }
 0x121   :  { %705 = vmatmul.mubr.bf16.gmra.mrb[24].mxu1 %v280_v24  ;;  %vm239_vm14 = vcmp.gt.f32.partialorder %v213_v29, 0.0  ;;  %v255_v34 = vmul.f32 0.2, %v213_v29  ;;  %v216_v36 = vadd.f32 %v998_v35, %v215_v33  ;;  %v870_v35 = vmov 0  }
 0x122   :  { %vm242_vm15 = vcmp.gt.f32.partialorder %v224_v32, 0.0  ;;  %v258_v37 = vmul.f32 0.2, %v224_v32  ;;  %v273_v38 = vsel %vm241_vm13, %v221_v27, %v257_v31  ;;  %780 = vset.pattern.permute.xlu0 %v870_v35 }
 0x123   :  { %vm240_vm0 = vcmp.gt.f32.partialorder %v216_v36, 0.0  ;;  %v256_v39 = vmul.f32 0.2, %v216_v36  ;;  %v271_v40 = vsel %vm239_vm14, %v213_v29, %v255_v34  ;;  %503 = vperm.xlu0 %780, %v500_v47  }
 0x124   :  { %v274_v41 = vsel %vm242_vm15, %v224_v32, %v258_v37 }
 0x125   :  { %v272_v42 = vsel %vm240_vm0, %v216_v36, %v256_v39  ;;  %v282_v43 = vpack.c.bf16 %v274_v41, %v273_v38 }
 0x126   :  { %v281_v44 = vpack.c.bf16 %v272_v42, %v271_v40 }
 0x128   :  { %708 = vmatprep.mubr.bf16.mxu1 %v281_v44 }
 0x129   :  { %709 = vmatmul.mubr.bf16.gmra.mrb[28].mxu1 %v282_v43 }
 0x1e4   :  { %v698_v49 = vpop.f32.mrb[16].mxu1 }
 0x1e5   :  { %v397_v50 = vadd.f32 %v698_v49, %v1020_v48  ;;  %v388_v51 = vpop.f32.mrb[17].mxu1 }
 0x1e6   :  { %v389_v52 = vadd.f32 %v1020_v48, %v388_v51  ;;  %v699_v53 = vpop.f32.mrb[18].mxu1 }
 0x1e7   :  { %v469_v54 = vmul.f32 0.2, %v397_v50  ;;  %v400_v55 = vadd.f32 %v699_v53, %v1020_v48  ;;  %v391_v56 = vpop.f32.mrb[19].mxu1  ;;  %vm453_vm2 = vcmp.gt.f32.partialorder %v397_v50, 0.0 }
 0x1e8   :  { %v467_v57 = vmul.f32 0.2, %v389_v52  ;;  %v392_v58 = vadd.f32 %v1020_v48, %v391_v56  ;;  %vm451_vm4 = vcmp.gt.f32.partialorder %v389_v52, 0.0 }
 0x1e9   :  { %vm454_vm3 = vcmp.gt.f32.partialorder %v400_v55, 0.0  ;;  %v470_v59 = vmul.f32 0.2, %v400_v55  ;;  %v485_v61 = vsel %vm453_vm2, %v397_v50, %v469_v54 }
 0x1ea   :  { %v468_v60 = vmul.f32 0.2, %v392_v58  ;;  %vm452_vm5 = vcmp.gt.f32.partialorder %v392_v58, 0.0  ;;  %v483_v0 = vsel %vm451_vm4, %v389_v52, %v467_v57 }
 0x1eb   :  { %v486_v62 = vsel %vm454_vm3, %v400_v55, %v470_v59  ;;  %v506_v59 = vlaneseq }
 0x1ec   :  { %v702_v63 = vpop.f32.mrb[20].mxu1  ;;  %v484_v1 = vsel %vm452_vm5, %v392_v58, %v468_v60  ;;  %v751_v2 = vpack.c.bf16 %v486_v62, %v485_v61  ;;  %v504_v62 = vpop.permute.xlu0 %503 }
 0x1ed   :  { %v413_v3 = vadd.f32 %v702_v63, %v1020_v48  ;;  %v404_v4 = vpop.f32.mrb[21].mxu1  ;;  %v748_v5 = vpack.c.bf16 %v484_v1, %v483_v0  ;;  %v507_v60 = vshrl.u32 %v506_v59, 7 }
 0x1ee   :  { %v405_v6 = vadd.f32 %v1020_v48, %v404_v4  ;;  %v703_v7 = vpop.f32.mrb[22].mxu1 }
 0x1ef   :  { %v473_v8 = vmul.f32 0.2, %v413_v3  ;;  %v416_v9 = vadd.f32 %v703_v7, %v1020_v48  ;;  %v407_v10 = vpop.f32.mrb[23].mxu1  ;;  %749 = vmatpush3.bf16.xpose.msra.mxu0 %v748_v5  ;;  %vm457_vm6 = vcmp.gt.f32.partialorder %v413_v3, 0.0  ;;  %v508_v61 = vsub.s32 0, %v507_v60 }
 0x1f0   :  { %v471_v11 = vmul.f32 0.2, %v405_v6  ;;  %v408_v12 = vadd.f32 %v1020_v48, %v407_v10  ;;  %750 = vmatprep.subr.bf16.mxu0 %v867_v45  ;;  %vm455_vm7 = vcmp.gt.f32.partialorder %v405_v6, 0.0 }
 0x1f1   :  { %vm458_vm8 = vcmp.gt.f32.partialorder %v416_v9, 0.0  ;;  %v474_v13 = vmul.f32 0.2, %v416_v9  ;;  %v489_v15 = vsel %vm457_vm6, %v413_v3, %v473_v8  ;;  %v509_v63 = vrot.slane %v504_v62, %v508_v61 }
 0x1f2   :  { %vm456_vm9 = vcmp.gt.f32.partialorder %v408_v12, 0.0  ;;  %v472_v14 = vmul.f32 0.2, %v408_v12  ;;  %v487_v18 = vsel %vm455_vm7, %v405_v6, %v471_v11 }
 0x1f3   :  { %v490_v16 = vsel %vm458_vm8, %v416_v9, %v474_v13 }
 0x1f4   :  { %v706_v17 = vpop.f32.mrb[24].mxu1  ;;  %v488_v19 = vsel %vm456_vm9, %v408_v12, %v472_v14  ;;  %v757_v20 = vpack.c.bf16 %v490_v16, %v489_v15 }
 0x1f5   :  { %v429_v21 = vadd.f32 %v706_v17, %v1020_v48  ;;  %v420_v22 = vpop.f32.mrb[25].mxu1  ;;  %v754_v23 = vpack.c.bf16 %v488_v19, %v487_v18 }
 0x1f6   :  { %v421_v24 = vadd.f32 %v1020_v48, %v420_v22  ;;  %v707_v25 = vpop.f32.mrb[26].mxu1 }
 0x1f7   :  { %752 = vmatpush3.bf16.xpose.msra.mxu0 %v751_v2  ;;  %vm461_vm10 = vcmp.gt.f32.partialorder %v429_v21, 0.0  ;;  %v477_v26 = vmul.f32 0.2, %v429_v21  ;;  %v432_v27 = vadd.f32 %v707_v25, %v1020_v48  ;;  %v423_v28 = vpop.f32.mrb[27].mxu1 }
 0x1f8   :  { %vm459_vm11 = vcmp.gt.f32.partialorder %v421_v24, 0.0  ;;  %v475_v29 = vmul.f32 0.2, %v421_v24  ;;  %v424_v30 = vadd.f32 %v1020_v48, %v423_v28  ;;  %753 = vmatprep.subr.bf16.mxu0 %v867_v45 }
 0x1f9   :  { %vm462_vm12 = vcmp.gt.f32.partialorder %v432_v27, 0.0  ;;  %v478_v31 = vmul.f32 0.2, %v432_v27  ;;  %v493_v32 = vsel %vm461_vm10, %v429_v21, %v477_v26 }
 0x1fa   :  { %vm460_vm13 = vcmp.gt.f32.partialorder %v424_v30, 0.0  ;;  %v476_v33 = vmul.f32 0.2, %v424_v30  ;;  %v491_v34 = vsel %vm459_vm11, %v421_v24, %v475_v29 }
 0x1fb   :  { %v494_v36 = vsel %vm462_vm12, %v432_v27, %v478_v31 }
 0x1fc   :  { %v710_v37 = vpop.f32.mrb[28].mxu1  ;;  %v492_v38 = vsel %vm460_vm13, %v424_v30, %v476_v33  ;;  %v763_v39 = vpack.c.bf16 %v494_v36, %v493_v32 }
 0x1fd   :  { %v445_v40 = vadd.f32 %v710_v37, %v1020_v48  ;;  %v436_v41 = vpop.f32.mrb[29].mxu1  ;;  %v760_v42 = vpack.c.bf16 %v492_v38, %v491_v34 }
 0x1fe   :  { %v437_v43 = vadd.f32 %v1020_v48, %v436_v41  ;;  %v711_v44 = vpop.f32.mrb[30].mxu1 }
 0x1ff   :  { %755 = vmatpush3.bf16.xpose.msra.mxu0 %v754_v23  ;;  %vm465_vm14 = vcmp.gt.f32.partialorder %v445_v40, 0.0  ;;  %v481_v46 = vmul.f32 0.2, %v445_v40  ;;  %v448_v47 = vadd.f32 %v711_v44, %v1020_v48  ;;  %v439_v35 = vpop.f32.mrb[31].mxu1 }
 0x200   :  { %756 = vmatprep.subr.bf16.mxu0 %v867_v45  ;;  %vm463_vm15 = vcmp.gt.f32.partialorder %v437_v43, 0.0  ;;  %v479_v49 = vmul.f32 0.2, %v437_v43  ;;  %v440_v50 = vadd.f32 %v1020_v48, %v439_v35  ;;  %v499_v48 = vld [vmem:[%s1065_s5] sm:$0x1] }
 0x201   :  { %vm466_vm0 = vcmp.gt.f32.partialorder %v448_v47, 0.0  ;;  %v482_v51 = vmul.f32 0.2, %v448_v47  ;;  %v497_v52 = vsel %vm465_vm14, %v445_v40, %v481_v46 }
 0x202   :  { %vm464_vm1 = vcmp.gt.f32.partialorder %v440_v50, 0.0  ;;  %v480_v53 = vmul.f32 0.2, %v440_v50  ;;  %v495_v54 = vsel %vm463_vm15, %v437_v43, %v479_v49 }
 0x203   :  { %v498_v55 = vsel %vm466_vm0, %v448_v47, %v482_v51 }
 0x204   :  { %v496_v56 = vsel %vm464_vm1, %v440_v50, %v480_v53  ;;  %v769_v57 = vpack.c.bf16 %v498_v55, %v497_v52 }
 0x205   :  { %v766_v58 = vpack.c.bf16 %v496_v56, %v495_v54 }
 0x207   :  { %758 = vmatpush3.bf16.xpose.msra.mxu0 %v757_v20 }
 0x208   :  { %759 = vmatprep.subr.bf16.mxu0 %v867_v45 }
 0x20f   :  { %761 = vmatpush3.bf16.xpose.msra.mxu0 %v760_v42 }
 0x210   :  { %762 = vmatprep.subr.bf16.mxu0 %v867_v45 }
 0x217   :  { %764 = vmatpush3.bf16.xpose.msra.mxu0 %v763_v39 }
 0x218   :  { %765 = vmatprep.subr.bf16.mxu0 %v867_v45 }
 0x21f   :  { %767 = vmatpush3.bf16.xpose.msra.mxu0 %v766_v58 }
 0x220   :  { %768 = vmatprep.subr.bf16.mxu0 %v867_v45 }
 0x227   :  { %770 = vmatpush3.bf16.xpose.msra.mxu0 %v769_v57 }
 0x22e   :  { %745 = vmatmul.mubr.f32.vlgmr.msra.gmra.mrb[0].mxu0 %v499_v48 }
 0x301   :  { %v576_v0 = vpop.f32.mrb[0].mxu0 }
 0x302   :  { %v577_v1 = vadd.f32 %v576_v0, %v509_v63  ;;  %v746_v2 = vpop.f32.mrb[1].mxu0 }
 0x304   :  { %580 = vst [vmem:[#allocation8] sm:$0x1] %v577_v1 }
 0x305   :  { %846 = shalt.err (!%p843_p6)
}
 0x306   :  { %s847_s16 = scalar_lea.hbm %s1067_s7, 16 }
 0x307   :  { %p848_p7 = scmp.ne.s32.totalorder %s1067_s7, %s847_s16  ;;  %p851_p8 = scmp.lt.u32.totalorder %s847_s16, %s1067_s7 }
 0x309   :  { %p853_p9 = pnand %p851_p8, %p848_p7 }
 0x30b   :  { %856 = shalt.err (!%p853_p9)
}
 0x30c   :  { %590 = dma.vmem_to_hbm [thread:$0]  %s588_s12, 16, %s1067_s7, [#allocation5]  }
 0x30d   :  { %861 = dma.done.wait [#allocation5], 16  }
 0x30e   :  { %862 = vsyncadd [#allocation5], 4294967280 }
 0x30f   :  { %594 = vsyncpa [#allocation4], 1 }
 0x310   :  { %595 = vsyncpa [#allocation7], 1 }
 0x311   :  { %596 = vsyncpa [#allocation5], 1 }

</bundles_post_ra>
